<compile_context>
chip_gen: v5e
topology: v5e:2x2
jax: 0.10.0
libtpu: 0.0.40
codegen_flags: <defaults>
</compile_context>

<pallas_src>
import functools

import jax
import jax.numpy as jnp
from jax import lax
from jax.experimental import pallas as pl
from jax.experimental.pallas import tpu as pltpu

LANE = 128


def _reduce_tile(x_ref, acc_ref, k, *, chunk, n_chunks, t_hw, hw_valid,
                 masked, unroll):
    """One fused pass over the (C, t_hw) tile updating lane-partial sum & max.

    The partial accumulators are carried as fori_loop values (register-resident
    for realistic C), and written back to the VMEM scratch once per tile.
    """
    def body(c, carry):
        s, m = carry
        start = pl.multiple_of(c * chunk, LANE)
        blk = x_ref[:, pl.ds(start, chunk)].astype(jnp.float32)   # (C, chunk)
        s = s + blk                                               # zero-pad exact
        if masked:
            # Compiled only for the last HW tile (ragged H*W).  The (1, chunk)
            # iota broadcasts over C; int32 index math is fine for any
            # realistic H*W (< 2**31 elements).
            lane = lax.broadcasted_iota(jnp.int32, (1, chunk), 1)
            valid = (k * t_hw + c * chunk + lane) < hw_valid
            blk = jnp.where(valid, blk, -jnp.inf)
        m = jnp.maximum(m, blk)
        return s, m

    s, m = lax.fori_loop(0, n_chunks, body, (acc_ref[0], acc_ref[1]),
                         unroll=unroll)
    acc_ref[0] = s
    acc_ref[1] = m


def _channel_attention_kernel(x_ref, w1_ref, w2_ref, o_ref, acc_ref, *,
                              hw_valid, t_hw, n_hw, need_mask, unroll):
    # x_ref  : (C, t_hw)    one batch row, one lane-dense slab of flattened H*W
    # w1_ref : (hidden, C)  fc1 1x1-conv weight (native PyTorch layout, no bias)
    # w2_ref : (C, hidden)  fc2 1x1-conv weight
    # o_ref  : (C, 1)       sigmoid(mlp(avg) + mlp(max)) for this batch row
    # acc_ref: (2, C, 128)  f32 lane-partials: [0] = running sum, [1] = running max
    k = pl.program_id(1)
    last = n_hw - 1
    n_chunks = t_hw // LANE
    reduce_tile = functools.partial(
        _reduce_tile, x_ref, acc_ref, k,
        chunk=LANE, n_chunks=n_chunks, t_hw=t_hw, hw_valid=hw_valid,
        unroll=unroll)

    @pl.when(k == 0)
    def _init():
        shp = acc_ref.shape[1:]
        acc_ref[0] = jnp.zeros(shp, jnp.float32)
        acc_ref[1] = jnp.full(shp, -jnp.inf, jnp.float32)

    if not need_mask:
        reduce_tile(masked=False)
    else:
        if n_hw > 1:
            @pl.when(k != last)
            def _full_tiles():
                reduce_tile(masked=False)

        @pl.when(k == last)
        def _ragged_tail_tile():
            reduce_tile(masked=True)

    @pl.when(k == last)
    def _finalize():
        # Single cross-lane (XLU) reduce of the lane-partials, then the tiny
        # shared MLP on the stacked (C, 2) = [avg | max] matrix, plus sigmoid.
        s = jnp.sum(acc_ref[0], axis=-1, keepdims=True)            # (C, 1)
        m = jnp.max(acc_ref[1], axis=-1, keepdims=True)            # (C, 1)
        col = lax.broadcasted_iota(jnp.int32, (s.shape[0], 2), 1)
        pooled = jnp.where(col == 0, s * (1.0 / hw_valid), m)      # (C, 2)
        h = jnp.dot(w1_ref[...], pooled,
                    preferred_element_type=jnp.float32)            # (hidden, 2)
        h = jnp.maximum(h, 0.0)                                    # ReLU
        y = jnp.dot(w2_ref[...], h,
                    preferred_element_type=jnp.float32)            # (C, 2)
        out = y[:, 0:1] + y[:, 1:2]                                # avg + max branch
        o_ref[...] = jax.nn.sigmoid(out).astype(o_ref.dtype)


def channel_attention(x_nchw, w1, w2, *, max_t_hw=None):
    """ChannelAttention forward.

    x_nchw: (B, C, H, W); w1: (hidden, C) fc1 weight; w2: (C, hidden) fc2 weight.
    Returns (B, C, 1, 1) attention weights, matching the PyTorch module.
    """
    B, C, H, W = x_nchw.shape
    hidden = w1.shape[0]
    HW = H * W

    x3 = x_nchw.reshape(B, C, HW)
    itemsize = jnp.dtype(x3.dtype).itemsize

    # Generation-aware VMEM budget (v7x: 64 MiB/TC; v5e/v6e: 128 MiB physical).
    try:
        vmem_cap = int(getattr(pltpu.get_tpu_info(), "vmem_capacity_bytes",
                               64 << 20))
    except Exception:
        vmem_cap = 64 << 20                       # conservative (v7x per-TC)
    per_buffer_budget = min(8 << 20, vmem_cap // 8)

    # Largest lane-dense HW tile within the per-buffer budget, multiple of 128.
    t_cap = max(LANE, (per_buffer_budget // max(1, C * itemsize)) // LANE * LANE)
    if max_t_hw is not None:                      # test hook: force smaller tiles
        t_cap = max(LANE, min(t_cap, (max_t_hw // LANE) * LANE))
    t_hw = int(min(t_cap, pl.cdiv(HW, LANE) * LANE))
    n_hw = int(pl.cdiv(HW, t_hw))
    hw_padded = n_hw * t_hw
    need_mask = hw_padded != HW
    if need_mask:
        # Zero pad: exact for the sum path; the kernel masks the ragged tail
        # with -inf for the max path, gated to the last HW tile only.
        x3 = jnp.pad(x3, ((0, 0), (0, 0), (0, hw_padded - HW)))

    # Weights stay in their native PyTorch (out_ch, in_ch) layout.
    w1f = w1.astype(jnp.float32)                  # (hidden, C)
    w2f = w2.astype(jnp.float32)                  # (C, hidden)

    n_chunks = t_hw // LANE
    unroll = max(1, min(8, n_chunks))

    # Scoped-VMEM limit from the actual footprint (2 pipeline buffers of x +
    # weights + lane-partial scratch + output) plus headroom, capped at 5/8 of
    # physical VMEM (~40 MiB on v7x).
    tile_bytes = C * t_hw * itemsize
    small_bytes = 4 * (2 * C * hidden + 2 * C * LANE + 2 * C)
    vmem_limit = 2 * tile_bytes + 2 * small_bytes + (4 << 20)
    vmem_limit = int(min(max(vmem_limit, 16 << 20), (vmem_cap * 5) // 8))

    cost = pl.CostEstimate(
        flops=2 * B * C * hw_padded + 8 * B * C * hidden,
        transcendentals=B * C,
        bytes_accessed=(B * C * hw_padded * itemsize
                        + 2 * C * hidden * 4 + B * C * 4),
    )

    kernel = functools.partial(
        _channel_attention_kernel,
        hw_valid=HW, t_hw=t_hw, n_hw=n_hw, need_mask=need_mask, unroll=unroll)

    out = pl.pallas_call(
        kernel,
        out_shape=jax.ShapeDtypeStruct((B, C, 1), jnp.float32),
        grid_spec=pltpu.PrefetchScalarGridSpec(
            num_scalar_prefetch=0,
            grid=(B, n_hw),                       # batch parallel, HW reduction last
            in_specs=[
                pl.BlockSpec((pl.Squeezed(), C, t_hw), lambda b, k: (b, 0, k)),
                pl.BlockSpec((hidden, C), lambda b, k: (0, 0)),
                pl.BlockSpec((C, hidden), lambda b, k: (0, 0)),
            ],
            out_specs=pl.BlockSpec((pl.Squeezed(), C, 1), lambda b, k: (b, 0, 0)),
            scratch_shapes=[pltpu.VMEM((2, C, LANE), jnp.float32)],  # [sum; max]
        ),
        compiler_params=pltpu.CompilerParams(
            dimension_semantics=("parallel", "arbitrary"),
            vmem_limit_bytes=vmem_limit,
        ),
        cost_estimate=cost,
    )(x3, w1f, w2f)

    return out.reshape(B, C, 1, 1)


def reference(x_nchw, w1, w2):
    """Pure-JAX reference mirroring the PyTorch forward."""
    avg = jnp.mean(x_nchw, axis=(2, 3))   # (B, C)
    mx = jnp.max(x_nchw, axis=(2, 3))     # (B, C)

    def mlp(v):
        return jnp.maximum(v @ w1.T, 0.0) @ w2.T

    return jax.nn.sigmoid(mlp(avg) + mlp(mx))[:, :, None, None]


if __name__ == "__main__":
    # PyTorch defaults (in_planes=2, ratio=8) give hidden=0, which is degenerate,
    # so use in_planes=16, ratio=8 -> hidden=2.
    B, C, H, W = 2, 16, 16, 16
    ratio = 8
    hidden = C // ratio

    key = jax.random.PRNGKey(0)
    kx, k1, k2 = jax.random.split(key, 3)

    x = jax.random.normal(kx, (B, C, H, W), dtype=jnp.float32)
    w1 = jax.random.normal(k1, (hidden, C), dtype=jnp.float32) * (2.0 / C) ** 0.5
    w2 = jax.random.normal(k2, (C, hidden), dtype=jnp.float32) * (2.0 / hidden) ** 0.5

    out = jax.block_until_ready(channel_attention(x, w1, w2))
    ref = reference(x, w1, w2)
    assert out.shape == (B, C, 1, 1), out.shape
    assert jnp.allclose(out, ref, atol=1e-5, rtol=1e-5), (
        float(jnp.max(jnp.abs(out - ref))))

    # Multi-tile accumulation path (HW=256 split into two 128-lane tiles).
    out2 = jax.block_until_ready(channel_attention(x, w1, w2, max_t_hw=128))
    assert jnp.allclose(out2, ref, atol=1e-5, rtol=1e-5), (
        float(jnp.max(jnp.abs(out2 - ref))))

    # Ragged / masked final-tile path (H*W = 81 -> padded to 128), shifted
    # negative so a wrong zero-pad max would be caught.
    xr = jax.random.normal(kx, (B, C, 9, 9), dtype=jnp.float32) - 1.0
    out3 = jax.block_until_ready(channel_attention(xr, w1, w2))
    ref3 = reference(xr, w1, w2)
    assert jnp.allclose(out3, ref3, atol=1e-5, rtol=1e-5), (
        float(jnp.max(jnp.abs(out3 - ref3))))

    # Multi-tile AND ragged tail (H*W = 169 -> two tiles, mask gated to last).
    xm = jax.random.normal(kx, (B, C, 13, 13), dtype=jnp.float32) - 1.0
    out4 = jax.block_until_ready(channel_attention(xm, w1, w2, max_t_hw=128))
    ref4 = reference(xm, w1, w2)
    assert jnp.allclose(out4, ref4, atol=1e-5, rtol=1e-5), (
        float(jnp.max(jnp.abs(out4 - ref4))))

    print("KERNEL_OK")
</pallas_src>

<mosaic_0001>
module attributes {stable_mosaic.version = 11 : i64} {
  func.func @_channel_attention_kernel(%arg0: i32, %arg1: i32, %arg2: memref<1x16x256xf32, #tpu.memory_space<vmem>>, %arg3: memref<2x16xf32, #tpu.memory_space<vmem>>, %arg4: memref<16x2xf32, #tpu.memory_space<vmem>>, %arg5: memref<1x16x1xf32, #tpu.memory_space<vmem>>, %arg6: memref<2x16x128xf32, #tpu.memory_space<vmem>>) attributes {dimension_semantics = [#tpu.dimension_semantics<parallel>, #tpu.dimension_semantics<arbitrary>], iteration_bounds = array<i64: 2, 1>, scalar_prefetch = 0 : i64, scratch_operands = 1 : i64, tpu.core_type = #tpu.core_type<tc>, window_params = [{transform_indices = @transform_0, window_bounds = array<i64: 1, 16, 256>}, {pipeline_mode = #tpu.pipeline_mode<synchronous>, transform_indices = @transform_1, window_bounds = array<i64: 2, 16>}, {pipeline_mode = #tpu.pipeline_mode<synchronous>, transform_indices = @transform_2, window_bounds = array<i64: 16, 2>}, {transform_indices = @transform_3, window_bounds = array<i64: 1, 16, 1>}]} {
    %c0_i32 = arith.constant 0 : i32
    %0 = arith.cmpi eq, %arg1, %c0_i32 : i32
    %1 = arith.extui %0 : i1 to i32
    %c0_i32_0 = arith.constant 0 : i32
    %2 = arith.cmpi ne, %1, %c0_i32_0 : i32
    scf.if %2 {
      %cst = arith.constant 0.000000e+00 : f32
      %30 = vector.broadcast %cst : f32 to vector<16x128xf32>
      %c0_19 = arith.constant 0 : index
      %c0_20 = arith.constant 0 : index
      %c0_21 = arith.constant 0 : index
      %31 = vector.load %arg6[%c0_19, %c0_20, %c0_21] : memref<2x16x128xf32, #tpu.memory_space<vmem>>, vector<1x16x128xf32>
      %32 = vector.shape_cast %31 : vector<1x16x128xf32> to vector<16x128xf32>
      %33 = vector.shape_cast %30 : vector<16x128xf32> to vector<1x16x128xf32>
      tpu.vector_store %arg6[%c0_19, %c0_20, %c0_21], %33 {strides = array<i32>} : memref<2x16x128xf32, #tpu.memory_space<vmem>>, vector<1x16x128xf32>,
      %cst_22 = arith.constant 0xFF800000 : f32
      %34 = vector.broadcast %cst_22 : f32 to vector<16x128xf32>
      %c1_23 = arith.constant 1 : index
      %c0_24 = arith.constant 0 : index
      %c0_25 = arith.constant 0 : index
      %35 = vector.load %arg6[%c1_23, %c0_24, %c0_25] : memref<2x16x128xf32, #tpu.memory_space<vmem>>, vector<1x16x128xf32>
      %36 = vector.shape_cast %35 : vector<1x16x128xf32> to vector<16x128xf32>
      %37 = vector.shape_cast %34 : vector<16x128xf32> to vector<1x16x128xf32>
      tpu.vector_store %arg6[%c1_23, %c0_24, %c0_25], %37 {strides = array<i32>} : memref<2x16x128xf32, #tpu.memory_space<vmem>>, vector<1x16x128xf32>,
    } else {
    }
    %c0 = arith.constant 0 : index
    %c0_1 = arith.constant 0 : index
    %c0_2 = arith.constant 0 : index
    %3 = vector.load %arg6[%c0, %c0_1, %c0_2] : memref<2x16x128xf32, #tpu.memory_space<vmem>>, vector<1x16x128xf32>
    %4 = vector.shape_cast %3 : vector<1x16x128xf32> to vector<16x128xf32>
    %c1 = arith.constant 1 : index
    %c0_3 = arith.constant 0 : index
    %c0_4 = arith.constant 0 : index
    %5 = vector.load %arg6[%c1, %c0_3, %c0_4] : memref<2x16x128xf32, #tpu.memory_space<vmem>>, vector<1x16x128xf32>
    %6 = vector.shape_cast %5 : vector<1x16x128xf32> to vector<16x128xf32>
    %c0_i32_5 = arith.constant 0 : i32
    %c128_i32 = arith.constant 128 : i32
    %7 = arith.muli %c0_i32_5, %c128_i32 : i32
    %8 = tpu.assume_multiple %7, 128 : i32
    %c0_6 = arith.constant 0 : index
    %c0_7 = arith.constant 0 : index
    %9 = arith.index_cast %8 : i32 to index
    %10 = vector.load %arg2[%c0_6, %c0_7, %9] : memref<1x16x256xf32, #tpu.memory_space<vmem>>, vector<1x16x128xf32>
    %11 = vector.shape_cast %10 : vector<1x16x128xf32> to vector<16x128xf32>
    %12 = arith.addf %4, %11 : vector<16x128xf32>
    %13 = arith.maximumf %6, %11 : vector<16x128xf32>
    %c1_i32 = arith.constant 1 : i32
    %c128_i32_8 = arith.constant 128 : i32
    %14 = arith.muli %c1_i32, %c128_i32_8 : i32
    %15 = tpu.assume_multiple %14, 128 : i32
    %c0_9 = arith.constant 0 : index
    %c0_10 = arith.constant 0 : index
    %16 = arith.index_cast %15 : i32 to index
    %17 = vector.load %arg2[%c0_9, %c0_10, %16] : memref<1x16x256xf32, #tpu.memory_space<vmem>>, vector<1x16x128xf32>
    %18 = vector.shape_cast %17 : vector<1x16x128xf32> to vector<16x128xf32>
    %19 = arith.addf %12, %18 : vector<16x128xf32>
    %20 = arith.maximumf %13, %18 : vector<16x128xf32>
    %c2_i32 = arith.constant 2 : i32
    %c0_11 = arith.constant 0 : index
    %c0_12 = arith.constant 0 : index
    %c0_13 = arith.constant 0 : index
    %21 = vector.load %arg6[%c0_11, %c0_12, %c0_13] : memref<2x16x128xf32, #tpu.memory_space<vmem>>, vector<1x16x128xf32>
    %22 = vector.shape_cast %21 : vector<1x16x128xf32> to vector<16x128xf32>
    %23 = vector.shape_cast %19 : vector<16x128xf32> to vector<1x16x128xf32>
    tpu.vector_store %arg6[%c0_11, %c0_12, %c0_13], %23 {strides = array<i32>} : memref<2x16x128xf32, #tpu.memory_space<vmem>>, vector<1x16x128xf32>,
    %c1_14 = arith.constant 1 : index
    %c0_15 = arith.constant 0 : index
    %c0_16 = arith.constant 0 : index
    %24 = vector.load %arg6[%c1_14, %c0_15, %c0_16] : memref<2x16x128xf32, #tpu.memory_space<vmem>>, vector<1x16x128xf32>
    %25 = vector.shape_cast %24 : vector<1x16x128xf32> to vector<16x128xf32>
    %26 = vector.shape_cast %20 : vector<16x128xf32> to vector<1x16x128xf32>
    tpu.vector_store %arg6[%c1_14, %c0_15, %c0_16], %26 {strides = array<i32>} : memref<2x16x128xf32, #tpu.memory_space<vmem>>, vector<1x16x128xf32>,
    %c0_i32_17 = arith.constant 0 : i32
    %27 = arith.cmpi eq, %arg1, %c0_i32_17 : i32
    %28 = arith.extui %27 : i1 to i32
    %c0_i32_18 = arith.constant 0 : i32
    %29 = arith.cmpi ne, %28, %c0_i32_18 : i32
    scf.if %29 {
      %c0_19 = arith.constant 0 : index
      %c0_20 = arith.constant 0 : index
      %c0_21 = arith.constant 0 : index
      %30 = vector.load %arg6[%c0_19, %c0_20, %c0_21] : memref<2x16x128xf32, #tpu.memory_space<vmem>>, vector<1x16x128xf32>
      %31 = vector.shape_cast %30 : vector<1x16x128xf32> to vector<16x128xf32>
      %cst = arith.constant dense<0.000000e+00> : vector<16xf32>
      %32 = vector.multi_reduction <add>, %31, %cst [1] : vector<16x128xf32> to vector<16xf32>
      %33 = vector.shape_cast %32 : vector<16xf32> to vector<16x1xf32>
      %c1_22 = arith.constant 1 : index
      %c0_23 = arith.constant 0 : index
      %c0_24 = arith.constant 0 : index
      %34 = vector.load %arg6[%c1_22, %c0_23, %c0_24] : memref<2x16x128xf32, #tpu.memory_space<vmem>>, vector<1x16x128xf32>
      %35 = vector.shape_cast %34 : vector<1x16x128xf32> to vector<16x128xf32>
      %cst_25 = arith.constant dense<0xFF800000> : vector<16xf32>
      %36 = vector.multi_reduction <maximumf>, %35, %cst_25 [1] : vector<16x128xf32> to vector<16xf32>
      %37 = vector.shape_cast %36 : vector<16xf32> to vector<16x1xf32>
      %38 = tpu.iota {dimensions = array<i32: 1>} : vector<16x2xi32>
      %c0_i32_26 = arith.constant 0 : i32
      %39 = vector.broadcast %c0_i32_26 : i32 to vector<16x2xi32>
      %40 = arith.cmpi eq, %38, %39 : vector<16x2xi32>
      %cst_27 = arith.constant 3.906250e-03 : f32
      %41 = vector.broadcast %cst_27 : f32 to vector<16x1xf32>
      %42 = arith.mulf %33, %41 : vector<16x1xf32>
      %43 = vector.shape_cast %42 : vector<16x1xf32> to vector<16x1xf32>
      %44 = vector.broadcast %43 : vector<16x1xf32> to vector<16x2xf32>
      %45 = vector.shape_cast %37 : vector<16x1xf32> to vector<16x1xf32>
      %46 = vector.broadcast %45 : vector<16x1xf32> to vector<16x2xf32>
      %47 = arith.select %40, %44, %46 : vector<16x2xi1>, vector<16x2xf32>
      %c0_28 = arith.constant 0 : index
      %c0_29 = arith.constant 0 : index
      %48 = vector.load %arg3[%c0_28, %c0_29] : memref<2x16xf32, #tpu.memory_space<vmem>>, vector<2x16xf32>
      %cst_30 = arith.constant dense<0.000000e+00> : vector<2x2xf32>
      %49 = tpu.matmul %48, %47, %cst_30 {dimension_numbers = #tpu.dot_dimension_numbers<[1], [0], [0], [1], [0, 0, 1, 1], [], []>} : vector<2x16xf32>, vector<16x2xf32>, vector<2x2xf32> -> vector<2x2xf32>
      %cst_31 = arith.constant 0.000000e+00 : f32
      %50 = vector.broadcast %cst_31 : f32 to vector<2x2xf32>
      %51 = arith.maximumf %49, %50 : vector<2x2xf32>
      %c0_32 = arith.constant 0 : index
      %c0_33 = arith.constant 0 : index
      %52 = vector.load %arg4[%c0_32, %c0_33] : memref<16x2xf32, #tpu.memory_space<vmem>>, vector<16x2xf32>
      %cst_34 = arith.constant dense<0.000000e+00> : vector<16x2xf32>
      %53 = tpu.matmul %52, %51, %cst_34 {dimension_numbers = #tpu.dot_dimension_numbers<[1], [0], [0], [1], [0, 0, 1, 1], [], []>} : vector<16x2xf32>, vector<2x2xf32>, vector<16x2xf32> -> vector<16x2xf32>
      %54 = vector.extract_strided_slice %53 {offsets = [0, 0], sizes = [16, 1], strides = [1, 1]} : vector<16x2xf32> to vector<16x1xf32>
      %55 = vector.extract_strided_slice %53 {offsets = [0, 1], sizes = [16, 1], strides = [1, 1]} : vector<16x2xf32> to vector<16x1xf32>
      %56 = arith.addf %54, %55 : vector<16x1xf32>
      %57 = arith.negf %56 : vector<16x1xf32>
      %58 = math.exp %57 : vector<16x1xf32>
      %cst_35 = arith.constant 1.000000e+00 : f32
      %59 = vector.broadcast %cst_35 : f32 to vector<16x1xf32>
      %60 = arith.addf %59, %58 : vector<16x1xf32>
      %61 = arith.divf %59, %60 : vector<16x1xf32>
      %c0_36 = arith.constant 0 : index
      %c0_37 = arith.constant 0 : index
      %c0_38 = arith.constant 0 : index
      %62 = vector.load %arg5[%c0_36, %c0_37, %c0_38] : memref<1x16x1xf32, #tpu.memory_space<vmem>>, vector<1x16x1xf32>
      %63 = vector.shape_cast %62 : vector<1x16x1xf32> to vector<16x1xf32>
      %64 = vector.shape_cast %61 : vector<16x1xf32> to vector<1x16x1xf32>
      tpu.vector_store %arg5[%c0_36, %c0_37, %c0_38], %64 {strides = array<i32>} : memref<1x16x1xf32, #tpu.memory_space<vmem>>, vector<1x16x1xf32>,
    } else {
    }
    return
  }
  func.func @transform_0(%arg0: i32, %arg1: i32) -> (i32, i32, i32) {
    %c0_i32 = arith.constant 0 : i32
    %c0_i32_0 = arith.constant 0 : i32
    return %arg0, %c0_i32, %arg1 : i32, i32, i32
  }
  func.func @transform_1(%arg0: i32, %arg1: i32) -> (i32, i32) {
    %c0_i32 = arith.constant 0 : i32
    %c0_i32_0 = arith.constant 0 : i32
    %c0_i32_1 = arith.constant 0 : i32
    return %c0_i32, %c0_i32_0 : i32, i32
  }
  func.func @transform_2(%arg0: i32, %arg1: i32) -> (i32, i32) {
    %c0_i32 = arith.constant 0 : i32
    %c0_i32_0 = arith.constant 0 : i32
    %c0_i32_1 = arith.constant 0 : i32
    return %c0_i32, %c0_i32_0 : i32, i32
  }
  func.func @transform_3(%arg0: i32, %arg1: i32) -> (i32, i32, i32) {
    %c0_i32 = arith.constant 0 : i32
    %c0_i32_0 = arith.constant 0 : i32
    %c0_i32_1 = arith.constant 0 : i32
    return %arg0, %c0_i32, %c0_i32_0 : i32, i32, i32
  }
}

</mosaic_0001>

<bundles_post_ra>
// kernel: tpu_custom_call.1
= control target key start
LH: loop header
LB: loop body
LE: loop exit
PB: predicated region body
PF: predicated region fallthrough
CT: control target
= control target key end

     0   :  { %8 = vsyncpa [#allocation4], 0  ;;  %s748_s0 = inlined_call_operand.hbm [shape: f32[2,16,256], index: 0, kind: input, shape index: {}]   ;;  %s749_s1 = inlined_call_operand.vmem [shape: f32[2,16], index: 1, kind: input, shape index: {}]   ;;  %s750_s2 = inlined_call_operand.vmem [shape: f32[16,2], index: 2, kind: input, shape index: {}]   ;;  %s751_s3 = inlined_call_operand.vmem [shape: f32[2,16,1], index: 3, kind: output, shape index: {}]  }
   0x1   :  { %10 = vsyncpa [#allocation4 + $0x1], 0  ;;  %s649_s12 = smov 0   ;;  %s651_s13 = smov 0  }
   0x2   :  { %s653_s14 = smov 0   ;;  %s655_s15 = smov 0  }
   0x3   :  { %s657_s16 = smov 0   ;;  %s659_s17 = smov 0  }
   0x4 LB: > { %s454_s18 = sadd.s32 4294967295, %s624_s17   ;;  %s28_s19 = sadd.s32 1, %s620_s16  ;;  %s624_s17 = sphi %s659_s17, %s16_s17   ;;  %s620_s16 = sphi %s657_s16, %s758_s16   ;;  %s616_s15 = sphi %s655_s15, %s757_s15   ;;  %s612_s14 = sphi %s653_s14, %s756_s14   ;;  %s608_s13 = sphi %s651_s13, %s755_s13   ;;  %s604_s12 = sphi %s649_s12, %s754_s12  }
   0x5   : > { %p30_p0 = scmp.ge.s32.totalorder %s28_s19, 2  ;;  %s37_s20 = sadd.s32 1, %s612_s14 }
   0x6   : > { %p44_p1 = scmp.ne.s32.totalorder %s612_s14, %s608_s13  ;;  %p45_p2 = scmp.eq.s32.totalorder %s624_s17, 0 }
   0x7   : > { %s760_s19 = smov (%p30_p0, %s28_s19), 0  ;;  %p50_p4 = scmp.ne.s32.totalorder %s608_s13, %s604_s12 }
   0x8   : > { %p685_p3 = por %p45_p2, %p44_p1  ;;  %s32_s22 = ssub.s32 %s620_s16, %s760_s19 }
   0x9   : > { %p51_p5 = scmp.eq.s32.totalorder %s454_s18, 0  ;;  %p35_p6 = scmp.eq.s32.totalorder %s32_s22, 0 }
   0xa   : > { %p484_p8 = scmp.lt.s32.totalorder %s624_s17, 2  ;;  %s148_s25 = sand.u32 1, %s612_s14  }
   0xb   : > { %p692_p7 = por %p51_p5, %p50_p4  ;;  %s475_s26 = sshll.u32 %s620_s16, 5 }
   0xc   : > { %s698_s24 = scalar_select %p35_p6, %s612_s14, %s37_s20  }
   0xd   : > { %s458_s27 = sshll.u32 %s148_s25, 5  ;;  %s159_s30 = scalar_lea.hbm %s748_s0, %s475_s26 }
   0xe   : > { %s160_s4 = sshll.u32 %s159_s30, 4  ;;  %s152_s5 = scalar_lea.vmem [#allocation3], %s458_s27  ;;  %s161_s4 = int_to_ptr.hbm [resolvable:$true] %s160_s4 }
   0xf   : > { %s162_s6 = sshll.u32 %s152_s5, 4  ;;  %p481_p9 = pnand %p484_p8, %p685_p3  ;;  %s163_s6 = int_to_ptr.vmem [resolvable:$true] %s162_s6 }
  0x10   : > { %p461_p10 = scmp.ge.s32.totalorder %s624_s17, 1  ;;  %p170_p11 = scmp.lt.s32.totalorder %s624_s17, 3 }
  0x11   : > { %s149_s7 = scalar_lea.sflag [#allocation4], %s148_s25  ;;  %s626_s8 = smov 256  }
  0x12   : > { %s627_s9 = smov 16   ;;  %p171_p12 = pnand %p461_p10, %p170_p11 }
  0x13   : > { %483 = dma.hbm_to_vmem [thread:$0]  (!%p481_p9), %s161_s4, 512, %s163_s6, %s149_s7, %s626_s8, %s626_s8, %s627_s9  }
  0x14   : > { %174 = sbr.rel (%p171_p12) target bundleno = 542 (0x21e), region = 32  ;;  %s176_s10 = sand.u32 (!%p171_p12), 1, %s608_s13  }
  0x15   : > { %s462_s11 = sshll.u32 (!%p171_p12), %s176_s10, 5  ;;  %s177_s12 = scalar_lea.sflag (!%p171_p12), [#allocation4], %s176_s10 }
  0x16   : > { %s180_s18 = scalar_lea.vmem (!%p171_p12), [#allocation3], %s462_s11 }
  0x19   : > { %599 = dma.done.wait (%p692_p7), %s177_s12, 512  }
  0x1a   : > { %601 = vsyncadd (%p692_p7), %s177_s12, 4294966784  ;;  %v225_v0 = vld [vmem:[%s180_s18 + $0x10] sm:$0xff]  ;;  %v466_v1 = vld [vmem:[%s180_s18 + $0x18] sm:$0xff]  ;;  %v256_v8 = vlaneseq  ;;  %vm264_vm1 = vcmask 130048   ;;  %vm298_vm2 = vcmask 1041408   ;;  %vm291_vm3 = vcmask 15360  }
  0x1b   : > { %v234_v2 = vadd.f32 %v466_v1, %v225_v0  ;;  %v236_v3 = vmax.f32 %v225_v0, %v466_v1  ;;  %v224_v4 = vld [vmem:[%s180_s18] sm:$0xff]  ;;  %v465_v5 = vld [vmem:[%s180_s18 + $0x8] sm:$0xff]  ;;  %s628_s27 = smov 127   ;;  %p205_p13 = scmp.lt.s32.totalorder %s616_s15, 1  ;;  %vm373_vm6 = vcmask 7168  }
  0x1c   : > { %v233_v6 = vadd.f32 %v465_v5, %v224_v4  ;;  %v235_v7 = vmax.f32 %v224_v4, %v465_v5  ;;  %v257_v9 = vand.u32 127, %v256_v8  ;;  %v263_v17 = vld [vmem:[%s749_s1] sm:$0x3]  ;;  %v290_v22 = vld [vmem:[%s750_s2 + $0x8] sm:$0xff] }
  0x1d   : > { %248 = vadd.xlane.f32.xlu0 %v234_v2  ;;  %254 = vmax.xlane.f32.xlu1 %v236_v3  ;;  %v289_v21 = vld [vmem:[%s750_s2] sm:$0xff]  ;;  %s762_s15 = smov (!%p205_p13, %s616_s15), 1 }
  0x1e   : > { %vm258_vm0 = vcmp.eq.s32.totalorder %v257_v9, 0  ;;  %s476_s28 = sshll.u32 %s762_s15, 4 }
  0x1f   : > { %s209_s4 = scalar_lea.vmem %s751_s3, %s476_s28 }
  0x25   : > { %246 = vadd.xlane.f32.xlu0 %v233_v6  ;;  %252 = vmax.xlane.f32.xlu1 %v235_v7 }
  0x90   : > { %v249_v10 = vpop.xlane.xlu0 %248  ;;  %v255_v11 = vpop.xlane.xlu1 %254 }
  0x91   : > { %v260_v12 = vmul.f32 0.00390625, %v249_v10 }
  0x93   : > { %v262_v13 = vsel %vm258_vm0, %v260_v12, %v255_v11 }
  0x94   : > { %282 = vmatpush.msra.mxu0 %v262_v13 }
  0x98   : > { %v247_v14 = vpop.xlane.xlu0 %246  ;;  %v253_v15 = vpop.xlane.xlu1 %252 }
  0x99   : > { %v259_v16 = vmul.f32 0.00390625, %v247_v14 }
  0x9b   : > { %v261_v18 = vsel %vm258_vm0, %v259_v16, %v253_v15 }
  0x9c   : > { %283 = vmatpush.msra.mxu0 %v261_v18 }
  0x9d   : > { %467 = vmatmul.msk.f32.vlgmr.msra.gmra.mxu0 %vm264_vm1, %v263_v17 }
 0x11a   : > { %v285_v19 = vpop.f32.mrf.mxu0 }
 0x11b   : > { %v288_v20 = vmax.f32 %v285_v19, 0.0 }
 0x11d   : > { %468 = vmatpush.msk.msra.mxu1 %vm298_vm2, %v288_v20  ;;  %477 = vmatpush.msk.msra.mxu2 %vm298_vm2, %v288_v20 }
 0x11e   : > { %469 = vmatmul.msk.f32.vlgmr.msra.gmra.mxu1 %vm291_vm3, %v289_v21  ;;  %470 = vmatmul.msk.f32.vlgmr.msra.gmra.mxu2 %vm291_vm3, %v290_v22 }
 0x19b   : > { %v319_v23 = vpop.f32.mrf.mxu1 }
 0x19c   : > { %327 = vrot.lane.b32.xlu2 %v319_v23, %s628_s27 }
 0x1a1   : > { %v322_v24 = vpop.f32.mrf.mxu2 }
 0x1a4   : > { %329 = vrot.lane.b32.xlu2 %v322_v24, %s628_s27 }
 0x1f6   : > { %v328_v25 = vpop.permute.xlu2 %327 }
 0x1f7   : > { %v333_v26 = vadd.f32 %v328_v25, %v319_v23 }
 0x1f9   : > { %v471_v27 = vmul.f32 -1.442695, %v333_v26 }
 0x1fb   : > { %536 = vpow2.f32 %v471_v27 }
 0x1fe   : > { %v330_v28 = vpop.permute.xlu2 %329 }
 0x1ff   : > { %v334_v29 = vadd.f32 %v330_v28, %v322_v24 }
 0x201   : > { %v537_v30 = vpop.eup %536  ;;  %v472_v31 = vmul.f32 -1.442695, %v334_v29 }
 0x202   : > { %v341_v32 = vadd.f32 1.0, %v537_v30 }
 0x203   : > { %538 = vpow2.f32 %v472_v31 }
 0x204   : > { %540 = vrcp.f32 %v341_v32  ;;  %v354_v38 = vand.u32 2147483648, %v341_v32  ;;  %v352_v40 = vand.u32 2147483647, %v341_v32  ;;  %vm348_vm5 = vweird.f32 %v341_v32 }
 0x206   : > { %v355_v43 = vor.u32 1.1754944e-38, %v354_v38  ;;  %vm353_vm8 = vcmp.eq.f32.partialorder %v352_v40, 8.507059e+37 }
 0x209   : > { %v539_v33 = vpop.eup %538 }
 0x20a   : > { %v541_v34 = vpop.eup %540  ;;  %v342_v35 = vadd.f32 1.0, %v539_v33 }
 0x20b   : > { %v344_v36 = vmul.f32 %v541_v34, %v341_v32  ;;  %vm349_vm4 = vweird.f32 %v541_v34 }
 0x20c   : > { %542 = vrcp.f32 %v342_v35  ;;  %vm350_vm7 = vmor %vm348_vm5, %vm349_vm4  ;;  %v369_v48 = vand.u32 2147483648, %v342_v35  ;;  %v367_v50 = vand.u32 2147483647, %v342_v35  ;;  %vm363_vm10 = vweird.f32 %v342_v35 }
 0x20d   : > { %v345_v37 = vsub.f32 1.0, %v344_v36 }
 0x20e   : > { %v370_v52 = vor.u32 1.1754944e-38, %v369_v48  ;;  %vm368_vm12 = vcmp.eq.f32.partialorder %v367_v50, 8.507059e+37 }
 0x20f   : > { %v346_v39 = vmul.f32 %v541_v34, %v345_v37 }
 0x211   : > { %v347_v41 = vadd.f32 %v541_v34, %v346_v39 }
 0x212   : > { %v543_v42 = vpop.eup %542 }
 0x213   : > { %v351_v44 = vsel %vm350_vm7, %v541_v34, %v347_v41  ;;  %v359_v45 = vmul.f32 %v543_v42, %v342_v35  ;;  %vm364_vm9 = vweird.f32 %v543_v42 }
 0x214   : > { %v356_v46 = vsel %vm353_vm8, %v355_v43, %v351_v44  ;;  %vm365_vm11 = vmor %vm363_vm10, %vm364_vm9 }
 0x215   : > { %374 = vst.msk [vmem:[%s209_s4] sm:$0xff] %vm373_vm6, %v356_v46  ;;  %v360_v47 = vsub.f32 1.0, %v359_v45 }
 0x217   : > { %v361_v49 = vmul.f32 %v543_v42, %v360_v47 }
 0x219   : > { %v362_v51 = vadd.f32 %v543_v42, %v361_v49 }
 0x21b   : > { %v366_v53 = vsel %vm365_vm11, %v543_v42, %v362_v51 }
 0x21c   : > { %v371_v54 = vsel %vm368_vm12, %v370_v52, %v366_v53 }
 0x21d   : > { %375 = vst.msk [vmem:[%s209_s4 + $0x8] sm:$0xff] %vm373_vm6, %v371_v54 }
 0x21e PF: > { %s16_s17 = sadd.s32 1, %s624_s17   ;;  %s754_s12 = smov %s608_s13 }
 0x21f   : > { %p13_p0 = scmp.ge.s32.totalorder %s16_s17, 4   ;;  %s755_s13 = smov %s612_s14 }
 0x220   : > { %s756_s14 = smov %s698_s24  ;;  %s757_s15 = smov %s620_s16 }
 0x221   : > { %s758_s16 = smov %s760_s19  ;;  %15 = sbr.rel (!%p13_p0) target bundleno = 4 (0x4), region = 83 }
 0x226   :  { %397 = vsyncpa [#allocation4], 1 }
 0x227   :  { %399 = vsyncpa [#allocation4 + $0x1], 1 }

</bundles_post_ra>
